<compile_context>
chip_gen: v7x
topology: tpu7x:2x2x1
jax: 0.10.0
libtpu: 0.0.40
codegen_flags: <defaults>
</compile_context>

<pallas_src>
import functools

import jax
import jax.numpy as jnp
from jax.experimental import pallas as pl
from jax.experimental.pallas import tpu as pltpu


def _round_up(n, m):
    return ((n + m - 1) // m) * m


def _focal_loss_kernel(gamma, true_b, tb,
                       x_ref, t_ref, wt_ref, lwt_ref, o_ref, acc_ref):
    c = pl.program_id(0)          # core / parallel axis
    j = pl.program_id(1)          # batch-tile / reduction axis

    @pl.when(j == 0)
    def _():
        acc_ref[...] = jnp.zeros_like(acc_ref)

    x = x_ref[...].astype(jnp.float32)     # (TB, C) logits (f32 compute)
    t = t_ref[...]                         # (TB, 1) int32 labels
    wt = wt_ref[...]                       # (TB, 1) f32 weight[target]
    lwt = lwt_ref[...]                     # (TB, 1) f32 log(weight[target])

    # log-sum-exp softmax along the class (lane) axis == F.softmax(dim=1)
    m = jnp.max(x, axis=1, keepdims=True)                      # (TB, 1)
    lse = jnp.log(jnp.sum(jnp.exp(x - m), axis=1, keepdims=True))

    # gather the target logit without materializing a float one-hot
    col = jax.lax.broadcasted_iota(jnp.int32, x.shape, 1)
    x_t = jnp.sum(jnp.where(col == t, x, 0.0), axis=1, keepdims=True)

    log_soft_t = x_t - m - lse
    log_p = lwt + log_soft_t               # log(weight[t] * softmax[t])
    p = wt * jnp.exp(log_soft_t)           # weight[t] * softmax[t]

    # focal modulation (gamma is a static Python float)
    if gamma == 0.0:
        mod = jnp.ones_like(p)
    elif gamma == 1.0:
        mod = 1.0 - p
    elif gamma == 2.0:
        q = 1.0 - p
        mod = q * q
    else:
        # NOTE: if any class weight > 1, (1 - p) can go negative and a
        # non-integer gamma yields NaN — same behavior as the PyTorch ref.
        mod = jnp.power(1.0 - p, gamma)

    loss = -1.0 * mod * log_p                                   # (TB, 1)

    # mask rows beyond the true batch (ragged last block / redundant blocks)
    row = (c * pl.num_programs(1) + j) * tb + jax.lax.broadcasted_iota(
        jnp.int32, loss.shape, 0)
    loss = jnp.where(row < true_b, loss, 0.0)

    # per-row VPU accumulate; the sublane reduce happens once at the end
    acc_ref[...] += loss

    @pl.when(j == pl.num_programs(1) - 1)
    def _():
        o_ref[...] = jnp.sum(acc_ref[...], axis=0, keepdims=True)


def focal_loss(x, target, weight=None, gamma=0.0, block_rows=None):
    """Pallas implementation of FocalLoss.forward. Returns shape (1,) like torch."""
    B, C = x.shape

    if weight is None:
        weight = jnp.ones((C,), jnp.float32)
    w = jnp.asarray(weight, jnp.float32).reshape(C)

    # per-row gathered weight (and its log) — removes the in-kernel class-axis
    # weight broadcast + select + cross-lane reduce, at 8 B/row of HBM traffic.
    t32 = target.astype(jnp.int32)
    wt = w[t32].reshape(B, 1)
    lwt = jnp.log(w)[t32].reshape(B, 1)
    t2 = t32.reshape(B, 1)

    itemsize = int(jnp.dtype(x.dtype).itemsize)

    # Batch-tile sizing: keep (double-buffered native x tile) + (~4 f32 tiles of
    # in-kernel temporaries) inside a ~36 MiB working set under an explicit
    # 48 MiB scoped-VMEM limit (fits v5e/v6e 128 MiB and v7x 64 MiB physical).
    VMEM_LIMIT = 48 * 1024 * 1024
    VMEM_BUDGET = 36 * 1024 * 1024
    bytes_per_row = C * (2 * itemsize + 16) + 64
    tb_cap = max(8, ((VMEM_BUDGET // bytes_per_row) // 8) * 8)
    TB = min(_round_up(B, 8), tb_cap)
    if block_rows is not None:                 # test / tuning override
        TB = min(_round_up(int(block_rows), 8), TB)
    G = pl.cdiv(B, TB)                         # batch tiles (ragged tail is fine)

    # Split the batch reduction across TensorCores (v7x has 2 TCs; this is a
    # no-op cost on single-TC v5e/v6e).  Redundant tail blocks are clamped in
    # the index_map and their rows are killed by the row mask.
    NC = 2 if G >= 2 else 1
    G2 = pl.cdiv(G, NC)

    def row_map(ci, ji):
        return (jnp.minimum(ci * G2 + ji, G - 1), 0)

    kernel = functools.partial(_focal_loss_kernel, float(gamma), int(B), int(TB))

    cost = pl.CostEstimate(
        flops=int(8 * B * C),
        transcendentals=int(B * C + 2 * B),
        bytes_accessed=int(B * C * itemsize + 12 * B + 4 * NC),
    )

    partial_sums = pl.pallas_call(
        kernel,
        out_shape=jax.ShapeDtypeStruct((NC, 1), jnp.float32),
        grid=(NC, G2),
        in_specs=[
            pl.BlockSpec((TB, C), row_map),    # logits, native dtype, no padding
            pl.BlockSpec((TB, 1), row_map),    # target
            pl.BlockSpec((TB, 1), row_map),    # weight[target]
            pl.BlockSpec((TB, 1), row_map),    # log(weight[target])
        ],
        out_specs=pl.BlockSpec((1, 1), lambda ci, ji: (ci, 0)),
        scratch_shapes=[pltpu.VMEM((TB, 1), jnp.float32)],
        compiler_params=pltpu.CompilerParams(
            dimension_semantics=("parallel", "arbitrary"),
            vmem_limit_bytes=VMEM_LIMIT,
        ),
        cost_estimate=cost,
    )(x, t2, wt, lwt)

    # per-core partial sums -> mean over the true batch
    return (jnp.sum(partial_sums) * (1.0 / B)).reshape(1)


def _focal_loss_ref(x, target, weight, gamma):
    """Plain-JAX reference mirroring the PyTorch module."""
    soft = jax.nn.softmax(x.astype(jnp.float32), axis=1)
    mask = jax.nn.one_hot(target, x.shape[1], dtype=jnp.float32) * weight[None, :]
    probs = jnp.sum(soft * mask, axis=1, keepdims=True)
    log_p = jnp.log(probs)
    mod = jnp.ones_like(probs) if gamma == 0.0 else jnp.power(1.0 - probs, gamma)
    loss = -1.0 * mod * log_p
    return jnp.mean(loss, axis=0)


if __name__ == "__main__":
    key = jax.random.PRNGKey(0)

    cases = [
        # (B, C, gamma, block_rows)
        (8, 32, 2.0, None),    # unpadded C (not a multiple of 128), gamma=2 fast path
        (13, 40, 0.5, None),   # ragged batch + non-integer gamma
        (37, 16, 1.0, 8),      # multi-tile grid, 2-way core split, clamped tail block
    ]
    for B, C, gamma, br in cases:
        key, kx, kt = jax.random.split(key, 3)
        x = jax.random.normal(kx, (B, C), dtype=jnp.float32)
        target = jax.random.randint(kt, (B,), 0, C, dtype=jnp.int32)
        weight = 0.5 + 0.5 * jnp.arange(C, dtype=jnp.float32) / C  # weights in [0.5, 1)

        out = jax.block_until_ready(
            focal_loss(x, target, weight, gamma=gamma, block_rows=br))
        ref = jax.block_until_ready(_focal_loss_ref(x, target, weight, gamma))
        assert out.shape == (1,), out.shape
        assert jnp.allclose(out, ref, rtol=1e-5, atol=1e-5), (B, C, gamma, out, ref)

    print("KERNEL_OK")
</pallas_src>

<mosaic_0001>
module attributes {stable_mosaic.version = 11 : i64} {
  func.func @_focal_loss_kernel(%arg0: i32, %arg1: i32, %arg2: memref<8x32xf32, #tpu.memory_space<vmem>>, %arg3: memref<8x1xi32, #tpu.memory_space<vmem>>, %arg4: memref<8x1xf32, #tpu.memory_space<vmem>>, %arg5: memref<8x1xf32, #tpu.memory_space<vmem>>, %arg6: memref<1x1xf32, #tpu.memory_space<vmem>>, %arg7: memref<8x1xf32, #tpu.memory_space<vmem>>) attributes {dimension_semantics = [#tpu.dimension_semantics<parallel>, #tpu.dimension_semantics<arbitrary>], iteration_bounds = array<i64: 1, 1>, scalar_prefetch = 0 : i64, scratch_operands = 1 : i64, tpu.core_type = #tpu.core_type<tc>, window_params = [{transform_indices = @transform_0, window_bounds = array<i64: 8, 32>}, {transform_indices = @transform_1, window_bounds = array<i64: 8, 1>}, {transform_indices = @transform_2, window_bounds = array<i64: 8, 1>}, {transform_indices = @transform_3, window_bounds = array<i64: 8, 1>}, {transform_indices = @transform_4, window_bounds = array<i64: 1, 1>}]} {
    %c0_i32 = arith.constant 0 : i32
    %0 = arith.cmpi eq, %arg1, %c0_i32 : i32
    %1 = arith.extui %0 : i1 to i32
    %c0_i32_0 = arith.constant 0 : i32
    %2 = arith.cmpi ne, %1, %c0_i32_0 : i32
    scf.if %2 {
      %cst_21 = arith.constant 0.000000e+00 : f32
      %49 = vector.broadcast %cst_21 : f32 to vector<8x1xf32>
      %c0_22 = arith.constant 0 : index
      %c0_23 = arith.constant 0 : index
      %50 = vector.load %arg7[%c0_22, %c0_23] : memref<8x1xf32, #tpu.memory_space<vmem>>, vector<8x1xf32>
      tpu.vector_store %arg7[%c0_22, %c0_23], %49 {strides = array<i32>} : memref<8x1xf32, #tpu.memory_space<vmem>>, vector<8x1xf32>,
    } else {
    }
    %c0 = arith.constant 0 : index
    %c0_1 = arith.constant 0 : index
    %3 = vector.load %arg2[%c0, %c0_1] : memref<8x32xf32, #tpu.memory_space<vmem>>, vector<8x32xf32>
    %c0_2 = arith.constant 0 : index
    %c0_3 = arith.constant 0 : index
    %4 = vector.load %arg3[%c0_2, %c0_3] : memref<8x1xi32, #tpu.memory_space<vmem>>, vector<8x1xi32>
    %c0_4 = arith.constant 0 : index
    %c0_5 = arith.constant 0 : index
    %5 = vector.load %arg4[%c0_4, %c0_5] : memref<8x1xf32, #tpu.memory_space<vmem>>, vector<8x1xf32>
    %c0_6 = arith.constant 0 : index
    %c0_7 = arith.constant 0 : index
    %6 = vector.load %arg5[%c0_6, %c0_7] : memref<8x1xf32, #tpu.memory_space<vmem>>, vector<8x1xf32>
    %cst = arith.constant dense<0xFF800000> : vector<8xf32>
    %7 = vector.multi_reduction <maximumf>, %3, %cst [1] : vector<8x32xf32> to vector<8xf32>
    %8 = vector.shape_cast %7 : vector<8xf32> to vector<8x1xf32>
    %9 = vector.broadcast %8 : vector<8x1xf32> to vector<8x32xf32>
    %10 = arith.subf %3, %9 : vector<8x32xf32>
    %11 = math.exp %10 : vector<8x32xf32>
    %cst_8 = arith.constant dense<0.000000e+00> : vector<8xf32>
    %12 = vector.multi_reduction <add>, %11, %cst_8 [1] : vector<8x32xf32> to vector<8xf32>
    %13 = vector.shape_cast %12 : vector<8xf32> to vector<8x1xf32>
    %14 = math.log %13 : vector<8x1xf32>
    %15 = tpu.iota {dimensions = array<i32: 1>} : vector<8x32xi32>
    %16 = vector.broadcast %4 : vector<8x1xi32> to vector<8x32xi32>
    %17 = arith.cmpi eq, %15, %16 : vector<8x32xi32>
    %cst_9 = arith.constant 0.000000e+00 : f32
    %18 = vector.broadcast %cst_9 : f32 to vector<8x32xf32>
    %19 = arith.select %17, %3, %18 : vector<8x32xi1>, vector<8x32xf32>
    %cst_10 = arith.constant dense<0.000000e+00> : vector<8xf32>
    %20 = vector.multi_reduction <add>, %19, %cst_10 [1] : vector<8x32xf32> to vector<8xf32>
    %21 = vector.shape_cast %20 : vector<8xf32> to vector<8x1xf32>
    %22 = arith.subf %21, %8 : vector<8x1xf32>
    %23 = arith.subf %22, %14 : vector<8x1xf32>
    %24 = arith.addf %6, %23 : vector<8x1xf32>
    %25 = math.exp %23 : vector<8x1xf32>
    %26 = arith.mulf %5, %25 : vector<8x1xf32>
    %cst_11 = arith.constant 1.000000e+00 : f32
    %27 = vector.broadcast %cst_11 : f32 to vector<8x1xf32>
    %28 = arith.subf %27, %26 : vector<8x1xf32>
    %29 = arith.mulf %28, %28 : vector<8x1xf32>
    %cst_12 = arith.constant -1.000000e+00 : f32
    %30 = vector.broadcast %cst_12 : f32 to vector<8x1xf32>
    %31 = arith.mulf %30, %29 : vector<8x1xf32>
    %32 = arith.mulf %31, %24 : vector<8x1xf32>
    %c1_i32 = arith.constant 1 : i32
    %33 = arith.muli %arg0, %c1_i32 : i32
    %34 = arith.addi %33, %arg1 : i32
    %c8_i32 = arith.constant 8 : i32
    %35 = arith.muli %34, %c8_i32 : i32
    %36 = tpu.iota {dimensions = array<i32: 0>} : vector<8x1xi32>
    %37 = vector.broadcast %35 : i32 to vector<8x1xi32>
    %38 = arith.addi %37, %36 : vector<8x1xi32>
    %c8_i32_13 = arith.constant 8 : i32
    %39 = vector.broadcast %c8_i32_13 : i32 to vector<8x1xi32>
    %40 = arith.cmpi slt, %38, %39 : vector<8x1xi32>
    %cst_14 = arith.constant 0.000000e+00 : f32
    %41 = vector.broadcast %cst_14 : f32 to vector<8x1xf32>
    %42 = arith.select %40, %32, %41 : vector<8x1xi1>, vector<8x1xf32>
    %c0_15 = arith.constant 0 : index
    %c0_16 = arith.constant 0 : index
    %43 = vector.load %arg7[%c0_15, %c0_16] : memref<8x1xf32, #tpu.memory_space<vmem>>, vector<8x1xf32>
    %44 = arith.addf %43, %42 : vector<8x1xf32>
    %c0_17 = arith.constant 0 : index
    %c0_18 = arith.constant 0 : index
    %45 = vector.load %arg7[%c0_17, %c0_18] : memref<8x1xf32, #tpu.memory_space<vmem>>, vector<8x1xf32>
    tpu.vector_store %arg7[%c0_17, %c0_18], %44 {strides = array<i32>} : memref<8x1xf32, #tpu.memory_space<vmem>>, vector<8x1xf32>,
    %c0_i32_19 = arith.constant 0 : i32
    %46 = arith.cmpi eq, %arg1, %c0_i32_19 : i32
    %47 = arith.extui %46 : i1 to i32
    %c0_i32_20 = arith.constant 0 : i32
    %48 = arith.cmpi ne, %47, %c0_i32_20 : i32
    scf.if %48 {
      %c0_21 = arith.constant 0 : index
      %c0_22 = arith.constant 0 : index
      %49 = vector.load %arg7[%c0_21, %c0_22] : memref<8x1xf32, #tpu.memory_space<vmem>>, vector<8x1xf32>
      %cst_23 = arith.constant dense<0.000000e+00> : vector<1xf32>
      %50 = vector.multi_reduction <add>, %49, %cst_23 [0] : vector<8x1xf32> to vector<1xf32>
      %51 = vector.shape_cast %50 : vector<1xf32> to vector<1x1xf32>
      %c0_24 = arith.constant 0 : index
      %c0_25 = arith.constant 0 : index
      %52 = vector.load %arg6[%c0_24, %c0_25] : memref<1x1xf32, #tpu.memory_space<vmem>>, vector<1x1xf32>
      tpu.vector_store %arg6[%c0_24, %c0_25], %51 {strides = array<i32>} : memref<1x1xf32, #tpu.memory_space<vmem>>, vector<1x1xf32>,
    } else {
    }
    return
  }
  func.func @transform_0(%arg0: i32, %arg1: i32) -> (i32, i32) {
    %c1_i32 = arith.constant 1 : i32
    %0 = arith.muli %arg0, %c1_i32 : i32
    %1 = arith.addi %0, %arg1 : i32
    %c0_i32 = arith.constant 0 : i32
    %2 = arith.minsi %1, %c0_i32 : i32
    %c0_i32_0 = arith.constant 0 : i32
    %c0_i32_1 = arith.constant 0 : i32
    return %2, %c0_i32_0 : i32, i32
  }
  func.func @transform_1(%arg0: i32, %arg1: i32) -> (i32, i32) {
    %c1_i32 = arith.constant 1 : i32
    %0 = arith.muli %arg0, %c1_i32 : i32
    %1 = arith.addi %0, %arg1 : i32
    %c0_i32 = arith.constant 0 : i32
    %2 = arith.minsi %1, %c0_i32 : i32
    %c0_i32_0 = arith.constant 0 : i32
    %c0_i32_1 = arith.constant 0 : i32
    return %2, %c0_i32_0 : i32, i32
  }
  func.func @transform_2(%arg0: i32, %arg1: i32) -> (i32, i32) {
    %c1_i32 = arith.constant 1 : i32
    %0 = arith.muli %arg0, %c1_i32 : i32
    %1 = arith.addi %0, %arg1 : i32
    %c0_i32 = arith.constant 0 : i32
    %2 = arith.minsi %1, %c0_i32 : i32
    %c0_i32_0 = arith.constant 0 : i32
    %c0_i32_1 = arith.constant 0 : i32
    return %2, %c0_i32_0 : i32, i32
  }
  func.func @transform_3(%arg0: i32, %arg1: i32) -> (i32, i32) {
    %c1_i32 = arith.constant 1 : i32
    %0 = arith.muli %arg0, %c1_i32 : i32
    %1 = arith.addi %0, %arg1 : i32
    %c0_i32 = arith.constant 0 : i32
    %2 = arith.minsi %1, %c0_i32 : i32
    %c0_i32_0 = arith.constant 0 : i32
    %c0_i32_1 = arith.constant 0 : i32
    return %2, %c0_i32_0 : i32, i32
  }
  func.func @transform_4(%arg0: i32, %arg1: i32) -> (i32, i32) {
    %c0_i32 = arith.constant 0 : i32
    %c0_i32_0 = arith.constant 0 : i32
    return %arg0, %c0_i32 : i32, i32
  }
}

</mosaic_0001>

<bundles_post_ra>
// kernel: tpu_custom_call.1
= control target key start
LH: loop header
LB: loop body
LE: loop exit
PB: predicated region body
PF: predicated region fallthrough
CT: control target
= control target key end

     0   :  { %vm136_vm0 = vcmask 261120   ;;  %s323_s0 = inlined_call_operand.vmem [shape: f32[8,32], index: 0, kind: input, shape index: {}]   ;;  %s324_s1 = inlined_call_operand.vmem [shape: s32[8,1], index: 1, kind: input, shape index: {}]   ;;  %s325_s2 = inlined_call_operand.vmem [shape: f32[8,1], index: 2, kind: input, shape index: {}]   ;;  %s326_s3 = inlined_call_operand.vmem [shape: f32[8,1], index: 3, kind: input, shape index: {}]   ;;  %s327_s4 = inlined_call_operand.hbm [shape: f32[1,1], index: 4, kind: output, shape index: {}]  }
   0x1   :  { %v132_v0 = vld [vmem:[%s323_s0] sm:$0xff] }
   0x2   :  { %9 = vsyncpa [#allocation4], 0  ;;  %v137_v1 = vsel %vm136_vm0, %v132_v0, -inf  ;;  %v265_v2 = vmov 0   ;;  %v133_v3 = vld [vmem:[%s324_s1] sm:$0xff]  ;;  %v148_v7 = vlaneseq  ;;  %vm130_vm2 = vcmask 7168  }
   0x3   :  { %234 = vset.pattern.permute.xlu0 %v265_v2  ;;  %v266_v14 = vmov 0.0   ;;  %v134_v22 = vld [vmem:[%s325_s2] sm:$0xff]  ;;  %s267_s2 = smov [#allocation3]   ;;  %vm191_vm3 = vcmask 0  }
   0x4   :  { %138 = vmax.xlane.f32.xlu0 %v137_v1  ;;  %v149_v8 = vand.u32 127, %v148_v7  ;;  %131 = vst.msk [vmem:[#allocation2] sm:$0xff] %vm130_vm2, %v266_v14  ;;  %v135_v26 = vld [vmem:[%s326_s3] sm:$0xff]  ;;  %s199_s21 = sshll.u32 %s267_s2, 4  ;;  %s200_s21 = int_to_ptr.vmem [resolvable:$true] %s199_s21 }
   0x5   :  { %s241_s3 = scalar_lea.vmem %s200_s21, 16  ;;  %s245_s22 = scalar_lea.vmem %s200_s21, 32 }
   0x6   :  { %p242_p0 = scmp.ne.s32.totalorder %s200_s21, %s241_s3  ;;  %p246_p1 = scmp.lt.s32.totalorder %s200_s21, %s200_s21 }
   0x7   :  { %p247_p2 = scmp.lt.s32.totalorder %s245_s22, %s241_s3 }
   0x9   :  { %p248_p3 = por %p247_p2, %p246_p1 }
   0xb   :  { %v176_v30 = vld [vmem:[#allocation2] sm:$0xff]  ;;  %p249_p4 = pnand %p248_p3, %p242_p0 }
  0x1a   :  { %151 = vperm.xlu0 %234, %v133_v3  }
  0x91   :  { %v139_v4 = vpop.xlane.xlu0 %138 }
  0x92   :  { %v140_v5 = vsub.f32 %v132_v0, %v139_v4 }
  0x94   :  { %v141_v6 = vmul.f32 1.442695, %v140_v5 }
  0x96   :  { %235 = vpow2.f32 %v141_v6 }
  0x99   :  { %v152_v9 = vpop.permute.xlu0 %151 }
  0x9a   :  { %vm153_vm1 = vcmp.eq.s32.totalorder %v149_v8, %v152_v9 }
  0x9b   :  { %v154_v11 = vsel %vm153_vm1, %v132_v0, 0.0 }
  0x9c   :  { %v155_v13 = vsel %vm136_vm0, %v154_v11, 0.0 }
  0xa0   :  { %v236_v10 = vpop.eup %235 }
  0xa1   :  { %v143_v12 = vsel %vm136_vm0, %v236_v10, 0.0 }
  0xa2   :  { %144 = vadd.xlane.f32.xlu1 %v143_v12 }
  0xa6   :  { %156 = vadd.xlane.f32.xlu1 %v155_v13 }
 0x12f   :  { %v145_v15 = vpop.xlane.xlu1 %144 }
 0x130   :  { %237 = vlog2.f32 %v145_v15 }
 0x133   :  { %v157_v16 = vpop.xlane.xlu1 %156 }
 0x134   :  { %v158_v19 = vsub.f32 %v157_v16, %v139_v4 }
 0x13a   :  { %v238_v17 = vpop.eup %237 }
 0x13b   :  { %v147_v18 = vmul.f32 0.6931472, %v238_v17 }
 0x13d   :  { %v159_v20 = vsub.f32 %v158_v19, %v147_v18 }
 0x13f   :  { %v161_v21 = vmul.f32 1.442695, %v159_v20  ;;  %v160_v28 = vadd.f32 %v159_v20, %v135_v26 }
 0x141   :  { %239 = vpow2.f32 %v161_v21 }
 0x14b   :  { %v240_v23 = vpop.eup %239 }
 0x14c   :  { %v163_v24 = vmul.f32 %v240_v23, %v134_v22 }
 0x14e   :  { %v164_v25 = vsub.f32 1.0, %v163_v24 }
 0x150   :  { %v165_v27 = vmul.f32 %v164_v25, %v164_v25 }
 0x152   :  { %v166_v29 = vmul.f32 -1.0, %v165_v27 }
 0x154   :  { %v167_v31 = vmul.f32 %v166_v29, %v160_v28 }
 0x156   :  { %v177_v32 = vadd.f32 %v176_v30, %v167_v31 }
 0x158   :  { %179 = vst.msk [vmem:[#allocation2] sm:$0xff] %vm130_vm2, %v177_v32 }
 0x15f   :  { %v183_v33 = vld [vmem:[#allocation2] sm:$0xff] }
 0x160   :  { %v184_v34 = vsel %vm130_vm2, %v183_v33, 0.0 }
 0x161   :  { %v185_v35 = vrot.slane %v184_v34, 4 }
 0x163   :  { %v186_v36 = vadd.f32 %v185_v35, %v184_v34 }
 0x165   :  { %v187_v37 = vrot.slane %v186_v36, 2 }
 0x167   :  { %v188_v38 = vadd.f32 %v187_v37, %v186_v36 }
 0x169   :  { %v189_v39 = vrot.slane %v188_v38, 1 }
 0x16b   :  { %v190_v40 = vadd.f32 %v189_v39, %v188_v38 }
 0x16d   :  { %192 = vst.msk [vmem:[#allocation3] sm:$0x1] %vm191_vm3, %v190_v40 }
 0x16e   :  { %252 = shalt.err (!%p249_p4)
}
 0x16f   :  { %s253_s25 = scalar_lea.hbm %s327_s4, 16 }
 0x170   :  { %p254_p5 = scmp.ne.s32.totalorder %s327_s4, %s253_s25  ;;  %p257_p6 = scmp.lt.u32.totalorder %s253_s25, %s327_s4 }
 0x172   :  { %p259_p7 = pnand %p257_p6, %p254_p5 }
 0x174   :  { %262 = shalt.err (!%p259_p7)
}
 0x175   :  { %202 = dma.vmem_to_hbm [thread:$0]  %s200_s21, 16, %s327_s4, [#allocation4]  }
 0x176   :  { %263 = dma.done.wait [#allocation4], 16  }
 0x177   :  { %264 = vsyncadd [#allocation4], 4294967280 }
 0x178   :  { %206 = vsyncpa [#allocation4], 1 }

</bundles_post_ra>
